<compile_context>
chip_gen: v5e
topology: v5e:2x2
jax: 0.10.0
libtpu: 0.0.40
codegen_flags: <defaults>
</compile_context>

<pallas_src>
import functools

import jax
import jax.numpy as jnp
from jax.experimental import pallas as pl
from jax.experimental.pallas import tpu as pltpu

MIN_LANE = 128               # lane-dense padding for hidden / class / feature dims
NODE_TILE_MAX = 512          # adjacency row/col tile (HBM-bound; 512 ~ 85% roofline)
FEAT_TILE_MAX = 512          # K tile for the X @ W matmul
VMEM_LIMIT = 32 * 1024 * 1024  # generous vs ~few MiB actually used; safe on v7x


def _round_up(v, m):
    return ((v + m - 1) // m) * m


def _divisor_tile(dim, max_tile):
    """Largest multiple of 128 that divides `dim` (a 128-multiple) and <= max_tile."""
    t = min(max_tile, dim)
    while dim % t:
        t -= MIN_LANE
    return t


# ----------------------------- Pallas kernels -----------------------------

def xw_kernel(x_ref, w_ref, out_ref, acc_ref):
    """out[i] = sum_k x[i, k] @ w[k]  (tiled matmul, f32 accumulation, bf16 out)."""
    k = pl.program_id(1)

    @pl.when(k == 0)
    def _():
        acc_ref[...] = jnp.zeros_like(acc_ref)

    acc_ref[...] += jnp.dot(x_ref[...], w_ref[...],
                            preferred_element_type=jnp.float32)

    @pl.when(k == pl.num_programs(1) - 1)
    def _():
        out_ref[...] = acc_ref[...].astype(out_ref.dtype)


def aggregate_kernel(mask_ref, adj_ref, xw_ref, b_ref, out_ref, acc_ref, *,
                     apply_relu):
    """out[i] = Ahat[i, :] @ XW + b (optionally ReLU); zero Ahat blocks skipped."""
    i = pl.program_id(0)
    k = pl.program_id(1)
    nk = pl.num_programs(1)

    @pl.when(k == 0)
    def _():
        acc_ref[...] = jnp.zeros_like(acc_ref)

    @pl.when(mask_ref[i * nk + k] != 0)
    def _():
        acc_ref[...] += jnp.dot(adj_ref[...], xw_ref[...],
                                preferred_element_type=jnp.float32)

    @pl.when(k == nk - 1)
    def _():
        h = acc_ref[...] + b_ref[...]          # b is [1, Hp], broadcasts
        if apply_relu:
            h = jnp.maximum(h, 0.0)
        out_ref[...] = h.astype(out_ref.dtype)


def aggregate_pool_kernel(mask_ref, adj_ref, xw_ref, b_ref, pool_ref,
                          part_ref, acc_ref):
    """conv2 + fused global_mean_pool, one partial pooled block per row tile.

    part[i] = pool[:, i_tile] @ (Ahat[i_tile, :] @ XW + b).  h2 never touches
    HBM; the row-tile axis is megacore-parallel because each i owns its own
    output block.  Zero Ahat blocks skip the MXU + accumulate.
    """
    i = pl.program_id(0)
    k = pl.program_id(1)
    nk = pl.num_programs(1)

    @pl.when(k == 0)
    def _():
        acc_ref[...] = jnp.zeros_like(acc_ref)

    @pl.when(mask_ref[i * nk + k] != 0)
    def _():
        acc_ref[...] += jnp.dot(adj_ref[...], xw_ref[...],
                                preferred_element_type=jnp.float32)

    @pl.when(k == nk - 1)
    def _():
        h = acc_ref[...] + b_ref[...]          # completed h2 row tile (f32)
        part = jnp.dot(pool_ref[...], h.astype(jnp.bfloat16),
                       preferred_element_type=jnp.float32)
        part_ref[...] = part[None, :, :]


def head_kernel(parts_ref, wc_ref, bc_ref, out_ref):
    """Reduce per-row-tile pooled partials, Linear, max-stabilized log_softmax."""
    pooled = jnp.sum(parts_ref[...], axis=0)             # [G, Hp] f32
    logits = jnp.dot(pooled.astype(jnp.bfloat16), wc_ref[...],
                     preferred_element_type=jnp.float32) + bc_ref[...]
    m = jnp.max(logits, axis=-1, keepdims=True)
    lse = jnp.log(jnp.sum(jnp.exp(logits - m), axis=-1, keepdims=True)) + m
    out_ref[...] = (logits - lse).astype(out_ref.dtype)


# ----------------------------- pallas_call wrappers -----------------------------

def _tiled_xw(x, w, node_tile):
    m, kdim = x.shape
    hp = w.shape[1]
    tm = node_tile
    tk = _divisor_tile(kdim, FEAT_TILE_MAX)
    grid = (m // tm, kdim // tk)
    return pl.pallas_call(
        xw_kernel,
        out_shape=jax.ShapeDtypeStruct((m, hp), jnp.bfloat16),
        grid_spec=pltpu.PrefetchScalarGridSpec(
            num_scalar_prefetch=0,
            grid=grid,
            in_specs=[pl.BlockSpec((tm, tk), lambda i, k: (i, k)),
                      pl.BlockSpec((tk, hp), lambda i, k: (k, 0))],
            out_specs=pl.BlockSpec((tm, hp), lambda i, k: (i, 0)),
            scratch_shapes=[pltpu.VMEM((tm, hp), jnp.float32)]),
        compiler_params=pltpu.CompilerParams(
            dimension_semantics=("parallel", "arbitrary"),
            vmem_limit_bytes=VMEM_LIMIT),
    )(x, w)


def _tiled_aggregate(adj, xw, b, block_mask, node_tile, *, apply_relu):
    np_ = adj.shape[0]
    hp = xw.shape[1]
    t = node_tile
    grid = (np_ // t, np_ // t)
    # NOTE(v5e): if the adjacency DMA is still exposed after enlarging tiles,
    # pipeline_mode=pl.Buffered(3) on the adj in_spec is cheap with 128 MiB VMEM.
    return pl.pallas_call(
        functools.partial(aggregate_kernel, apply_relu=apply_relu),
        out_shape=jax.ShapeDtypeStruct((np_, hp), jnp.bfloat16),
        grid_spec=pltpu.PrefetchScalarGridSpec(
            num_scalar_prefetch=1,
            grid=grid,
            in_specs=[pl.BlockSpec((t, t), lambda i, k, m: (i, k)),
                      pl.BlockSpec((t, hp), lambda i, k, m: (k, 0)),
                      pl.BlockSpec((1, hp), lambda i, k, m: (0, 0))],
            out_specs=pl.BlockSpec((t, hp), lambda i, k, m: (i, 0)),
            scratch_shapes=[pltpu.VMEM((t, hp), jnp.float32)]),
        compiler_params=pltpu.CompilerParams(
            dimension_semantics=("parallel", "arbitrary"),
            vmem_limit_bytes=VMEM_LIMIT),
    )(block_mask, adj, xw, b)


def _tiled_aggregate_pool(adj, xw, b, pool, block_mask, node_tile):
    np_ = adj.shape[0]
    hp = xw.shape[1]
    gp = pool.shape[0]
    t = node_tile
    nrt = np_ // t
    grid = (nrt, nrt)
    return pl.pallas_call(
        aggregate_pool_kernel,
        out_shape=jax.ShapeDtypeStruct((nrt, gp, hp), jnp.float32),
        grid_spec=pltpu.PrefetchScalarGridSpec(
            num_scalar_prefetch=1,
            grid=grid,
            in_specs=[pl.BlockSpec((t, t), lambda i, k, m: (i, k)),
                      pl.BlockSpec((t, hp), lambda i, k, m: (k, 0)),
                      pl.BlockSpec((1, hp), lambda i, k, m: (0, 0)),
                      pl.BlockSpec((gp, t), lambda i, k, m: (0, i))],
            # Per-row-tile partial pooled block -> i axis is genuinely parallel.
            out_specs=pl.BlockSpec((1, gp, hp), lambda i, k, m: (i, 0, 0)),
            scratch_shapes=[pltpu.VMEM((t, hp), jnp.float32)]),
        compiler_params=pltpu.CompilerParams(
            dimension_semantics=("parallel", "arbitrary"),
            vmem_limit_bytes=VMEM_LIMIT),
    )(block_mask, adj, xw, b, pool)


# ----------------------------- graph preprocessing -----------------------------

def preprocess_graph(edge_index, batch, num_nodes, num_graphs, node_tile):
    """Padded bf16 Ahat, its block-nonzero mask, and the padded bf16 pool matrix.

    Depends only on (edge_index, batch); callers can cache the result across
    forward calls.  Ahat = D^-1/2 (A + I) D^-1/2 (PyG GCNConv normalization).
    NOTE: duplicate edges are de-duplicated by the dense scatter (PyG's
    gcn_norm would count them in the degrees).
    """
    np_ = _round_up(num_nodes, node_tile)
    gp = _round_up(num_graphs, 8)
    src, dst = edge_index[0], edge_index[1]

    a = jnp.zeros((np_, np_), jnp.float32)
    a = a.at[dst, src].set(1.0)                 # message flows src -> dst
    idx = jnp.arange(num_nodes)
    a = a.at[idx, idx].set(1.0)                 # self-loops on real nodes only
    deg = a.sum(axis=1)
    dinv = jnp.where(deg > 0, 1.0 / jnp.sqrt(deg), 0.0)
    adj = (dinv[:, None] * a * dinv[None, :]).astype(jnp.bfloat16)

    nrt = np_ // node_tile
    block_mask = jnp.any(
        adj.reshape(nrt, node_tile, nrt, node_tile) != 0,
        axis=(1, 3)).reshape(-1).astype(jnp.int32)

    one_hot = (batch[None, :] == jnp.arange(num_graphs)[:, None]).astype(jnp.float32)
    counts = jnp.maximum(one_hot.sum(axis=1, keepdims=True), 1.0)
    pool = jnp.zeros((gp, np_), jnp.float32)
    pool = pool.at[:num_graphs, :num_nodes].set(one_hot / counts)
    return adj, block_mask, pool.astype(jnp.bfloat16)


# ----------------------------- forward pass -----------------------------

def gcn_forward(x, edge_index, batch, params, num_graphs):
    n, f_in = x.shape
    w1, b1 = params["w1"], params["b1"]
    w2, b2 = params["w2"], params["b2"]
    wc, bc = params["wc"], params["bc"]
    hidden = w1.shape[1]
    ncls = wc.shape[1]

    # Empty-graph guard from the reference module.
    if n == 0 or edge_index.shape[1] == 0:
        return jnp.zeros((1, ncls), jnp.float32)

    # Node tile: large (512) for real graphs, only 128 for tiny ones; node
    # padding granularity == tile so the aggregation grids stay coarse.
    node_tile = min(NODE_TILE_MAX, _round_up(n, MIN_LANE))
    np_ = _round_up(n, node_tile)
    fp = _round_up(f_in, MIN_LANE)
    hp = _round_up(hidden, MIN_LANE)
    cp = _round_up(ncls, MIN_LANE)
    gp = _round_up(num_graphs, 8)

    # Cacheable per-graph preprocessing (padded bf16 Ahat / pool + block mask).
    adj_p, block_mask, pool_p = preprocess_graph(
        edge_index, batch, n, num_graphs, node_tile)

    # Pad inputs / weights; matmul operands are bf16, biases stay f32.
    x_p = jnp.zeros((np_, fp), jnp.float32).at[:n, :f_in].set(x).astype(jnp.bfloat16)
    w1_p = jnp.zeros((fp, hp), jnp.float32).at[:f_in, :hidden].set(w1).astype(jnp.bfloat16)
    b1_p = jnp.zeros((1, hp), jnp.float32).at[:, :hidden].set(b1)
    w2_p = jnp.zeros((hp, hp), jnp.float32).at[:hidden, :hidden].set(w2).astype(jnp.bfloat16)
    b2_p = jnp.zeros((1, hp), jnp.float32).at[:, :hidden].set(b2)
    wc_p = jnp.zeros((hp, cp), jnp.float32).at[:hidden, :ncls].set(wc).astype(jnp.bfloat16)
    bc_p = jnp.full((1, cp), -1e30, jnp.float32).at[:, :ncls].set(bc)  # mask pad classes

    # conv1 + ReLU  (dropout = identity in eval mode)
    xw1 = _tiled_xw(x_p, w1_p, node_tile)                              # [Np, Hp] bf16
    h1 = _tiled_aggregate(adj_p, xw1, b1_p, block_mask, node_tile,
                          apply_relu=True)                             # [Np, Hp] bf16

    # conv2 with fused global_mean_pool (h2 never materialized in HBM)
    xw2 = _tiled_xw(h1, w2_p, node_tile)                               # [Np, Hp] bf16
    parts = _tiled_aggregate_pool(adj_p, xw2, b2_p, pool_p,
                                  block_mask, node_tile)               # [R, Gp, Hp] f32

    # reduce partials + classifier + log_softmax (tiny, single block)
    out_p = pl.pallas_call(
        head_kernel,
        out_shape=jax.ShapeDtypeStruct((gp, cp), jnp.float32),
        compiler_params=pltpu.CompilerParams(vmem_limit_bytes=VMEM_LIMIT),
    )(parts, wc_p, bc_p)

    return out_p[:num_graphs, :ncls]


def init_params(key, in_dim, hidden, num_classes):
    k1, k2, k3 = jax.random.split(key, 3)

    def glorot(k, fan_in, fan_out):
        s = jnp.sqrt(6.0 / (fan_in + fan_out))
        return jax.random.uniform(k, (fan_in, fan_out), jnp.float32, -s, s)

    return {
        "w1": glorot(k1, in_dim, hidden),
        "b1": jnp.zeros((1, hidden), jnp.float32),
        "w2": glorot(k2, hidden, hidden),
        "b2": jnp.zeros((1, hidden), jnp.float32),
        "wc": glorot(k3, hidden, num_classes),
        "bc": jnp.zeros((1, num_classes), jnp.float32),
    }


if __name__ == "__main__":
    key = jax.random.PRNGKey(0)
    kx, kp = jax.random.split(key)

    # Small synthetic graph batch: 2 graphs x 8 nodes, undirected ring edges.
    NUM_NODES = 16
    IN_DIM = 32            # stands in for len(unique_words)
    HIDDEN = 16
    NUM_CLASSES = 2
    NUM_GRAPHS = 2

    x = jax.random.normal(kx, (NUM_NODES, IN_DIM), jnp.float32)

    s0 = jnp.arange(8, dtype=jnp.int32)
    d0 = (s0 + 1) % 8
    src = jnp.concatenate([s0, d0, s0 + 8, d0 + 8])
    dst = jnp.concatenate([d0, s0, d0 + 8, s0 + 8])
    edge_index = jnp.stack([src, dst])                       # [2, 32]
    batch = jnp.concatenate([jnp.zeros(8, jnp.int32), jnp.ones(8, jnp.int32)])

    params = init_params(kp, IN_DIM, HIDDEN, NUM_CLASSES)

    out = gcn_forward(x, edge_index, batch, params, NUM_GRAPHS)
    out = jax.block_until_ready(out)
    assert out.shape == (NUM_GRAPHS, NUM_CLASSES)
    # log-softmax rows should exponentiate-sum to ~1 (bf16 matmul tolerance)
    assert jnp.allclose(jnp.exp(out).sum(axis=-1), 1.0, atol=1e-3)
    print("KERNEL_OK")
</pallas_src>

<mosaic_0001>
module attributes {stable_mosaic.version = 11 : i64} {
  func.func @xw_kernel(%arg0: i32, %arg1: i32, %arg2: memref<128x128xbf16, #tpu.memory_space<vmem>>, %arg3: memref<128x128xbf16, #tpu.memory_space<vmem>>, %arg4: memref<128x128xbf16, #tpu.memory_space<vmem>>, %arg5: memref<128x128xf32, #tpu.memory_space<vmem>>) attributes {dimension_semantics = [#tpu.dimension_semantics<parallel>, #tpu.dimension_semantics<arbitrary>], iteration_bounds = array<i64: 1, 1>, scalar_prefetch = 0 : i64, scratch_operands = 1 : i64, tpu.core_type = #tpu.core_type<tc>, window_params = [{transform_indices = @transform_0, window_bounds = array<i64: 128, 128>}, {transform_indices = @transform_1, window_bounds = array<i64: 128, 128>}, {transform_indices = @transform_2, window_bounds = array<i64: 128, 128>}]} {
    %c0_i32 = arith.constant 0 : i32
    %0 = arith.cmpi eq, %arg1, %c0_i32 : i32
    %1 = arith.extui %0 : i1 to i32
    %c0_i32_0 = arith.constant 0 : i32
    %2 = arith.cmpi ne, %1, %c0_i32_0 : i32
    scf.if %2 {
      %cst_10 = arith.constant 0.000000e+00 : f32
      %12 = vector.broadcast %cst_10 : f32 to vector<128x128xf32>
      %c0_11 = arith.constant 0 : index
      %c0_12 = arith.constant 0 : index
      %13 = vector.load %arg5[%c0_11, %c0_12] : memref<128x128xf32, #tpu.memory_space<vmem>>, vector<128x128xf32>
      tpu.vector_store %arg5[%c0_11, %c0_12], %12 {strides = array<i32>} : memref<128x128xf32, #tpu.memory_space<vmem>>, vector<128x128xf32>,
    } else {
    }
    %c0 = arith.constant 0 : index
    %c0_1 = arith.constant 0 : index
    %3 = vector.load %arg5[%c0, %c0_1] : memref<128x128xf32, #tpu.memory_space<vmem>>, vector<128x128xf32>
    %c0_2 = arith.constant 0 : index
    %c0_3 = arith.constant 0 : index
    %4 = vector.load %arg2[%c0_2, %c0_3] : memref<128x128xbf16, #tpu.memory_space<vmem>>, vector<128x128xbf16>
    %c0_4 = arith.constant 0 : index
    %c0_5 = arith.constant 0 : index
    %5 = vector.load %arg3[%c0_4, %c0_5] : memref<128x128xbf16, #tpu.memory_space<vmem>>, vector<128x128xbf16>
    %cst = arith.constant dense<0.000000e+00> : vector<128x128xf32>
    %6 = tpu.matmul %4, %5, %cst {dimension_numbers = #tpu.dot_dimension_numbers<[1], [0], [0], [1], [0, 0, 1, 1], [], []>} : vector<128x128xbf16>, vector<128x128xbf16>, vector<128x128xf32> -> vector<128x128xf32>
    %7 = arith.addf %3, %6 : vector<128x128xf32>
    %c0_6 = arith.constant 0 : index
    %c0_7 = arith.constant 0 : index
    %8 = vector.load %arg5[%c0_6, %c0_7] : memref<128x128xf32, #tpu.memory_space<vmem>>, vector<128x128xf32>
    tpu.vector_store %arg5[%c0_6, %c0_7], %7 {strides = array<i32>} : memref<128x128xf32, #tpu.memory_space<vmem>>, vector<128x128xf32>,
    %c0_i32_8 = arith.constant 0 : i32
    %9 = arith.cmpi eq, %arg1, %c0_i32_8 : i32
    %10 = arith.extui %9 : i1 to i32
    %c0_i32_9 = arith.constant 0 : i32
    %11 = arith.cmpi ne, %10, %c0_i32_9 : i32
    scf.if %11 {
      %c0_10 = arith.constant 0 : index
      %c0_11 = arith.constant 0 : index
      %12 = vector.load %arg5[%c0_10, %c0_11] : memref<128x128xf32, #tpu.memory_space<vmem>>, vector<128x128xf32>
      %13 = arith.truncf %12 : vector<128x128xf32> to vector<128x128xbf16>
      %c0_12 = arith.constant 0 : index
      %c0_13 = arith.constant 0 : index
      %14 = vector.load %arg4[%c0_12, %c0_13] : memref<128x128xbf16, #tpu.memory_space<vmem>>, vector<128x128xbf16>
      tpu.vector_store %arg4[%c0_12, %c0_13], %13 {strides = array<i32>} : memref<128x128xbf16, #tpu.memory_space<vmem>>, vector<128x128xbf16>,
    } else {
    }
    return
  }
  func.func @transform_0(%arg0: i32, %arg1: i32) -> (i32, i32) {
    %c0_i32 = arith.constant 0 : i32
    return %arg0, %arg1 : i32, i32
  }
  func.func @transform_1(%arg0: i32, %arg1: i32) -> (i32, i32) {
    %c0_i32 = arith.constant 0 : i32
    %c0_i32_0 = arith.constant 0 : i32
    return %arg1, %c0_i32 : i32, i32
  }
  func.func @transform_2(%arg0: i32, %arg1: i32) -> (i32, i32) {
    %c0_i32 = arith.constant 0 : i32
    %c0_i32_0 = arith.constant 0 : i32
    return %arg0, %c0_i32 : i32, i32
  }
}

</mosaic_0001>

<bundles_post_ra>
// kernel: tpu_custom_call.1
= control target key start
LH: loop header
LB: loop body
LE: loop exit
PB: predicated region body
PF: predicated region fallthrough
CT: control target
= control target key end

     0   :  { %7 = vsyncpa [#allocation4], 0  ;;  %s632_s0 = inlined_call_operand.hbm [shape: bf16[128,128], index: 0, kind: input, shape index: {}]   ;;  %s633_s1 = inlined_call_operand.hbm [shape: bf16[128,128], index: 1, kind: input, shape index: {}]   ;;  %s634_s2 = inlined_call_operand.hbm [shape: bf16[128,128], index: 2, kind: output, shape index: {}]  }
   0x1   :  { %8 = vsyncpa [#allocation7], 0 }
   0x2   :  { %9 = vsyncpa [#allocation5], 0  ;;  %s14_s11 = sshll.u32 %s632_s0, 4  ;;  %s594_s12 = smov [#allocation3]   ;;  %s15_s11 = int_to_ptr.hbm [resolvable:$true] %s14_s11 }
   0x3   :  { %s16_s13 = sshll.u32 %s594_s12, 4  ;;  %s27_s16 = sshll.u32 %s633_s1, 4  ;;  %s17_s13 = int_to_ptr.vmem [resolvable:$true] %s16_s13  ;;  %s28_s16 = int_to_ptr.hbm [resolvable:$true] %s27_s16 }
   0x4   :  { %s595_s17 = smov 64   ;;  %s596_s18 = smov 4  }
   0x5   :  { %22 = dma.hbm_to_vmem [thread:$0]  %s15_s11, 1024, %s17_s13, [#allocation4], %s595_s17, %s595_s17, %s596_s18  }
   0x6   :  { %s597_s19 = smov [#allocation6]  }
   0x7   :  { %s29_s20 = sshll.u32 %s597_s19, 4  ;;  %s30_s20 = int_to_ptr.vmem [resolvable:$true] %s29_s20 }
   0x8   :  { %35 = dma.hbm_to_vmem [thread:$0]  %s28_s16, 1024, %s30_s20, [#allocation7], %s595_s17, %s595_s17, %s596_s18  }
   0x9   :  { %588 = dma.done.wait [#allocation4], 1024  }
   0xa   :  { %589 = vsyncadd [#allocation4], 4294966272 }
   0xb   :  { %590 = dma.done.wait [#allocation7], 1024  }
   0xc   :  { %591 = vsyncadd [#allocation7], 4294966272  ;;  %v439_v0 = vld [vmem:[#allocation6 + $0x38] sm:$0xff]  ;;  %v438_v1 = vld [vmem:[#allocation6 + $0x30] sm:$0xff]  ;;  %s598_s0 = smov [#allocation8]   ;;  %s346_s23 = sshll.u32 %s634_s2, 4  ;;  %s347_s23 = int_to_ptr.hbm [resolvable:$true] %s346_s23 }
   0xd   :  { %208 = vmatpush.bf16.msra.mxu0 %v439_v0  ;;  %487 = vmatpush.bf16.msra.mxu1 %v439_v0  ;;  %v437_v2 = vld [vmem:[#allocation6 + $0x28] sm:$0xff]  ;;  %v436_v3 = vld [vmem:[#allocation6 + $0x20] sm:$0xff]  ;;  %v435_v4 = vld [vmem:[#allocation6 + $0x18] sm:$0xff]  ;;  %s344_s1 = sshll.u32 %s598_s0, 4  ;;  %s345_s1 = int_to_ptr.vmem [resolvable:$true] %s344_s1 }
   0xe   :  { %488 = vmatpush.bf16.msra.mxu2 %v439_v0  ;;  %489 = vmatpush.bf16.msra.mxu3 %v439_v0  ;;  %v434_v5 = vld [vmem:[#allocation6 + $0x10] sm:$0xff]  ;;  %v433_v6 = vld [vmem:[#allocation6 + $0x8] sm:$0xff]  ;;  %v432_v7 = vld [vmem:[#allocation6] sm:$0xff] }
   0xf   :  { %v424_v8 = vld [vmem:[#allocation3] sm:$0xff]  ;;  %v426_v9 = vld [vmem:[#allocation3 + $0x10] sm:$0xff]  ;;  %v425_v12 = vld [vmem:[#allocation3 + $0x8] sm:$0xff] }
  0x10   :  { %v428_v10 = vld [vmem:[#allocation3 + $0x20] sm:$0xff]  ;;  %v430_v11 = vld [vmem:[#allocation3 + $0x30] sm:$0xff]  ;;  %v427_v13 = vld [vmem:[#allocation3 + $0x18] sm:$0xff] }
  0x11   :  { %209 = vmatpush.bf16.msra.mxu0 %v438_v1  ;;  %490 = vmatpush.bf16.msra.mxu1 %v438_v1  ;;  %v429_v14 = vld [vmem:[#allocation3 + $0x28] sm:$0xff]  ;;  %v431_v15 = vld [vmem:[#allocation3 + $0x38] sm:$0xff] }
  0x12   :  { %491 = vmatpush.bf16.msra.mxu2 %v438_v1  ;;  %492 = vmatpush.bf16.msra.mxu3 %v438_v1 }
  0x15   :  { %210 = vmatpush.bf16.msra.mxu0 %v437_v2  ;;  %493 = vmatpush.bf16.msra.mxu1 %v437_v2 }
  0x16   :  { %494 = vmatpush.bf16.msra.mxu2 %v437_v2  ;;  %495 = vmatpush.bf16.msra.mxu3 %v437_v2 }
  0x19   :  { %211 = vmatpush.bf16.msra.mxu0 %v436_v3  ;;  %496 = vmatpush.bf16.msra.mxu1 %v436_v3 }
  0x1a   :  { %497 = vmatpush.bf16.msra.mxu2 %v436_v3  ;;  %498 = vmatpush.bf16.msra.mxu3 %v436_v3 }
  0x1d   :  { %212 = vmatpush.bf16.msra.mxu0 %v435_v4  ;;  %499 = vmatpush.bf16.msra.mxu1 %v435_v4 }
  0x1e   :  { %500 = vmatpush.bf16.msra.mxu2 %v435_v4  ;;  %501 = vmatpush.bf16.msra.mxu3 %v435_v4 }
  0x21   :  { %213 = vmatpush.bf16.msra.mxu0 %v434_v5  ;;  %502 = vmatpush.bf16.msra.mxu1 %v434_v5 }
  0x22   :  { %503 = vmatpush.bf16.msra.mxu2 %v434_v5  ;;  %504 = vmatpush.bf16.msra.mxu3 %v434_v5 }
  0x25   :  { %214 = vmatpush.bf16.msra.mxu0 %v433_v6  ;;  %505 = vmatpush.bf16.msra.mxu1 %v433_v6 }
  0x26   :  { %506 = vmatpush.bf16.msra.mxu2 %v433_v6  ;;  %507 = vmatpush.bf16.msra.mxu3 %v433_v6 }
  0x29   :  { %215 = vmatpush.bf16.msra.mxu0 %v432_v7  ;;  %508 = vmatpush.bf16.msra.mxu1 %v432_v7 }
  0x2a   :  { %509 = vmatpush.bf16.msra.mxu2 %v432_v7  ;;  %510 = vmatpush.bf16.msra.mxu3 %v432_v7 }
  0x2c   :  { %216 = vmatmul.bf16.vlgmr.msra.gmra.mxu0 %v424_v8  ;;  %226 = vmatmul.bf16.vlgmr.msra.gmra.mxu1 %v426_v9 }
  0x2d   :  { %236 = vmatmul.bf16.vlgmr.msra.gmra.mxu2 %v428_v10  ;;  %246 = vmatmul.bf16.vlgmr.msra.gmra.mxu3 %v430_v11 }
  0x3c   :  { %221 = vmatmul.bf16.gmra.mxu0 %v425_v12  ;;  %231 = vmatmul.bf16.gmra.mxu1 %v427_v13 }
  0x3d   :  { %241 = vmatmul.bf16.gmra.mxu2 %v429_v14  ;;  %251 = vmatmul.bf16.gmra.mxu3 %v431_v15 }
  0xa9   :  { %v217_v16 = vpop.f32.mrf.mxu0  ;;  %v227_v17 = vpop.f32.mrf.mxu1 }
  0xb0   :  { %v237_v18 = vpop.f32.mrf.mxu2  ;;  %v247_v19 = vpop.f32.mrf.mxu3 }
  0xb1   :  { %v219_v20 = vpop.f32.mrf.mxu0  ;;  %v229_v21 = vpop.f32.mrf.mxu1 }
  0xb2   :  { %v443_v22 = vpack.c.bf16 %v219_v20, %v217_v16  ;;  %v453_v23 = vpack.c.bf16 %v229_v21, %v227_v17 }
  0xb4   :  { %444 = vst [vmem:[#allocation8] sm:$0xff] %v443_v22  }
  0xb5   :  { %481 = vst [vmem:[#allocation8 + $0x10] sm:$0xff] %v453_v23  }
  0xb8   :  { %v239_v24 = vpop.f32.mrf.mxu2  ;;  %v249_v25 = vpop.f32.mrf.mxu3 }
  0xb9   :  { %v463_v26 = vpack.c.bf16 %v239_v24, %v237_v18  ;;  %v473_v27 = vpack.c.bf16 %v249_v25, %v247_v19  ;;  %v222_v28 = vpop.f32.mrf.mxu0  ;;  %v232_v29 = vpop.f32.mrf.mxu1 }
  0xbb   :  { %483 = vst [vmem:[#allocation8 + $0x20] sm:$0xff] %v463_v26  }
  0xbc   :  { %485 = vst [vmem:[#allocation8 + $0x30] sm:$0xff] %v473_v27  }
  0xc0   :  { %v242_v30 = vpop.f32.mrf.mxu2  ;;  %v252_v31 = vpop.f32.mrf.mxu3 }
  0xc1   :  { %v224_v32 = vpop.f32.mrf.mxu0  ;;  %v234_v33 = vpop.f32.mrf.mxu1 }
  0xc2   :  { %v448_v34 = vpack.c.bf16 %v224_v32, %v222_v28  ;;  %v458_v35 = vpack.c.bf16 %v234_v33, %v232_v29 }
  0xc4   :  { %480 = vst [vmem:[#allocation8 + $0x8] sm:$0xff] %v448_v34  }
  0xc5   :  { %482 = vst [vmem:[#allocation8 + $0x18] sm:$0xff] %v458_v35  }
  0xc8   :  { %v244_v36 = vpop.f32.mrf.mxu2  ;;  %v254_v37 = vpop.f32.mrf.mxu3 }
  0xc9   :  { %v468_v38 = vpack.c.bf16 %v244_v36, %v242_v30  ;;  %v478_v39 = vpack.c.bf16 %v254_v37, %v252_v31 }
  0xcb   :  { %484 = vst [vmem:[#allocation8 + $0x28] sm:$0xff] %v468_v38  }
  0xcc   :  { %486 = vst [vmem:[#allocation8 + $0x38] sm:$0xff] %v478_v39  }
  0xcd   :  { %352 = dma.vmem_to_hbm [thread:$0]  %s345_s1, 1024, %s347_s23, [#allocation5], %s595_s17, %s595_s17, %s596_s18  }
  0xce   :  { %592 = dma.done.wait [#allocation5], 1024  }
  0xcf   :  { %593 = vsyncadd [#allocation5], 4294966272 }
  0xd0   :  { %357 = vsyncpa [#allocation4], 1 }
  0xd1   :  { %358 = vsyncpa [#allocation7], 1 }
  0xd2   :  { %359 = vsyncpa [#allocation5], 1 }

</bundles_post_ra>
